<compile_context>
chip_gen: v5e
topology: v5e:2x2
jax: 0.10.0
libtpu: 0.0.40
codegen_flags: <defaults>
</compile_context>

<pallas_src>
import functools

import jax
import jax.numpy as jnp
from jax.experimental import pallas as pl
from jax.experimental.pallas import tpu as pltpu

KSIZE = 7   # depthwise conv kernel size
PAD = 3     # conv padding


# ----------------------------------------------------------------------------
# Pallas kernel: one block of `Bb` batch elements, full ConvNeXt block.
# ----------------------------------------------------------------------------
def _convnext_kernel(xp_ref, dww_ref, vecs_ref, w1_ref, b1_ref, w2_ref,
                     out_ref):
  Bb = xp_ref.shape[0]
  T = out_ref.shape[1]
  C = out_ref.shape[2]

  xp = xp_ref[...]            # (Bb, T+6, C) f32, time already zero-padded
  dww = dww_ref[...]          # (7, C) depthwise weights
  vecs = vecs_ref[...]        # (2, C) packed per-channel vectors
  dwb = vecs[0:1, :]          # depthwise bias
  b2s = vecs[1:2, :]          # pwconv2 bias, pre-scaled by layer-scale gamma

  # ---- depthwise conv (k=7, pad=3, groups=C): 7 shifted elementwise MACs.
  # Halo padding was done once in the wrapper, so there is no VMEM scratch,
  # no zero-fill store and no store->load hazard inside the kernel.
  y = xp[:, 0:T, :] * dww[0:1, :]
  for k in range(1, KSIZE):
    y = y + xp[:, k:k + T, :] * dww[k:k + 1, :]
  y = y + dwb

  # ---- fold (Bb, T) into the matmul M dimension (free reshape: C stays last)
  y2 = y.reshape(Bb * T, C)

  # ---- LayerNorm statistics over channels, eps = 1e-6 (matches nn.LayerNorm).
  # The affine (gamma, beta) has been folded into w1/b1 in the wrapper, so the
  # kernel only normalizes.
  mu = jnp.mean(y2, axis=-1, keepdims=True)
  yc = y2 - mu
  var = jnp.mean(yc * yc, axis=-1, keepdims=True)
  yn = yc * jax.lax.rsqrt(var + 1e-6)

  # ---- pwconv1 (C -> 3C) + GELU + pwconv2 (3C -> C), single MXU issue each
  h = jnp.dot(yn, w1_ref[...], preferred_element_type=jnp.float32) + b1_ref[...]
  # TODO(synk): torch.nn.GELU() default is the exact erf form; the tanh form
  # (max abs err ~3e-4) is used so the transcendental runs on the EUP slot
  # instead of a long VPU polynomial + divide.
  h = 0.5 * h * (1.0 + jnp.tanh(0.7978845608028654 * (h + 0.044715 * h * h * h)))
  # layer-scale gamma is folded into w2/b2 -> no extra per-element multiply.
  o = jnp.dot(h, w2_ref[...], preferred_element_type=jnp.float32) + b2s

  # ---- residual
  out_ref[...] = xp[:, PAD:PAD + T, :] + o.reshape(Bb, T, C)


# ----------------------------------------------------------------------------
# Batch-block sizing: biggest divisor of B whose working set fits a
# conservative VMEM budget (input + output double-buffered + f32 temps).
# ----------------------------------------------------------------------------
def _auto_block_b(B, T, C, budget_bytes=24 * 1024 * 1024):
  per_b = 4 * (
      2 * (T + 2 * PAD) * C      # padded input, double-buffered
      + 2 * T * C                # output, double-buffered
      + T * C                    # dwconv / norm temp
      + T * 3 * C                # hidden activation
  )
  bb = max(1, min(B, budget_bytes // max(per_b, 1)))
  while B % bb:
    bb -= 1
  return bb


# ----------------------------------------------------------------------------
# Wrapper: layout plumbing, parameter folding + pallas_call.
# ----------------------------------------------------------------------------
def convnext_block_forward(params, x, *, block_b=None):
  """ConvNeXtBlock forward.  x: (B, C, T) in the PyTorch NCT layout."""
  B, C, T = x.shape
  C3 = 3 * C
  if block_b is None:
    block_b = _auto_block_b(B, T, C)
  assert B % block_b == 0, "batch must be divisible by block_b"

  # time-major layout + zero-pad time by 3 on each side for the k=7 dwconv
  x_t = jnp.transpose(x, (0, 2, 1)).astype(jnp.float32)        # (B, T, C)
  x_pad = jnp.pad(x_t, ((0, 0), (PAD, PAD), (0, 0)))           # (B, T+6, C)

  # Fold LayerNorm affine into pwconv1 and layer-scale gamma into pwconv2
  # (exact parameter algebra, done once outside the kernel):
  #   norm(y)*ng + nb followed by @w1 + b1  ==  norm(y) @ (ng*w1) + (nb@w1 + b1)
  #   (h@w2 + b2) * gs                      ==  h @ (w2*gs) + b2*gs
  ng, nb, gs = params["ng"], params["nb"], params["gs"]
  w1f = params["w1"] * ng.reshape(C, 1)                        # (C, 3C)
  b1f = params["b1"] + nb @ params["w1"]                       # (1, 3C)
  w2f = params["w2"] * gs                                      # (3C, C)
  b2f = params["b2"] * gs                                      # (1, C)

  # pack the two remaining (1, C) per-channel vectors into one parameter array
  vecs = jnp.concatenate([params["dwb"], b2f], axis=0)         # (2, C)

  grid_spec = pltpu.PrefetchScalarGridSpec(
      num_scalar_prefetch=0,
      grid=(B // block_b,),
      in_specs=[
          pl.BlockSpec((block_b, T + 2 * PAD, C), lambda b: (b, 0, 0)),
          pl.BlockSpec((KSIZE, C), lambda b: (0, 0)),
          pl.BlockSpec((2, C), lambda b: (0, 0)),
          pl.BlockSpec((C, C3), lambda b: (0, 0)),
          pl.BlockSpec((1, C3), lambda b: (0, 0)),
          pl.BlockSpec((C3, C), lambda b: (0, 0)),
      ],
      out_specs=pl.BlockSpec((block_b, T, C), lambda b: (b, 0, 0)),
  )

  y_t = pl.pallas_call(
      _convnext_kernel,
      grid_spec=grid_spec,
      out_shape=jax.ShapeDtypeStruct((B, T, C), jnp.float32),
      compiler_params=pltpu.CompilerParams(
          # batch blocks are independent -> shard across TensorCores
          dimension_semantics=("parallel",)),
  )(x_pad, params["dww"], vecs, w1f, b1f, w2f)

  return jnp.transpose(y_t, (0, 2, 1))                         # back to (B,C,T)


# ----------------------------------------------------------------------------
# Deterministic synthetic parameters (layouts noted vs. PyTorch).
# ----------------------------------------------------------------------------
def make_params(key, C, layer_scale_init_value=1.0 / 6.0):
  ks = jax.random.split(key, 8)
  f32 = jnp.float32

  def w(k, shape, std=0.2):
    return (std * jax.random.normal(k, shape)).astype(f32)

  p = {}
  # dwconv: torch weight (C, 1, 7) -> stored as (7, C) = weight[:, 0, :].T
  p["dww"] = w(ks[0], (KSIZE, C))
  p["dwb"] = w(ks[1], (1, C), std=0.1)
  # LayerNorm(C)
  p["ng"] = (1.0 + 0.1 * jax.random.normal(ks[2], (1, C))).astype(f32)
  p["nb"] = w(ks[3], (1, C), std=0.1)
  # pwconv1: torch Linear(C, 3C).weight (3C, C) -> stored transposed (C, 3C)
  p["w1"] = w(ks[4], (C, 3 * C))
  p["b1"] = w(ks[5], (1, 3 * C), std=0.1)
  # pwconv2: torch Linear(3C, C).weight (C, 3C) -> stored transposed (3C, C)
  p["w2"] = w(ks[6], (3 * C, C))
  p["b2"] = w(ks[7], (1, C), std=0.1)
  # layer-scale gamma (module init: layer_scale_init_value * ones(dim))
  p["gs"] = (layer_scale_init_value * jnp.ones((1, C))).astype(f32)
  return p


# ----------------------------------------------------------------------------
# Pure-JAX reference (PyTorch semantics, exact-erf GELU, unfolded parameters).
# ----------------------------------------------------------------------------
def ref_forward(params, x):
  B, C, T = x.shape
  xt = jnp.transpose(x, (0, 2, 1)).astype(jnp.float32)          # (B, T, C)
  xp = jnp.pad(xt, ((0, 0), (PAD, PAD), (0, 0)))

  acc = jnp.zeros((B, T, C), jnp.float32)
  for k in range(KSIZE):
    acc = acc + xp[:, k:k + T, :] * params["dww"][k]
  acc = acc + params["dwb"]

  mu = acc.mean(-1, keepdims=True)
  var = ((acc - mu) ** 2).mean(-1, keepdims=True)
  h = (acc - mu) / jnp.sqrt(var + 1e-6) * params["ng"] + params["nb"]

  h = jnp.einsum("btc,cd->btd", h, params["w1"]) + params["b1"]
  h = jax.nn.gelu(h, approximate=False)                          # nn.GELU()
  h = jnp.einsum("btd,dc->btc", h, params["w2"]) + params["b2"]
  h = params["gs"] * h
  out = xt + h
  return jnp.transpose(out, (0, 2, 1))


if __name__ == "__main__":
  # Small config consistent with the module: dim (channels) = 32, so
  # intermediate_dim = 96; time frames T = 16; batch = 4 processed as
  # 2 grid steps of 2 batch elements each (M = 32 rows per matmul).
  # TODO(synk): the AdaLayerNorm path (adanorm_num_embeddings != None) is not
  # implemented; only the default non-conditional LayerNorm path is covered.
  B, C, T = 4, 32, 16

  key = jax.random.PRNGKey(0)
  kp, kx = jax.random.split(key)
  params = make_params(kp, C)
  x = jax.random.normal(kx, (B, C, T), jnp.float32)

  fwd = jax.jit(functools.partial(convnext_block_forward, params, block_b=2))
  y = fwd(x)
  jax.block_until_ready(y)

  assert y.shape == (B, C, T)
  assert bool(jnp.all(jnp.isfinite(y)))

  y_ref = ref_forward(params, x)
  max_err = float(jnp.max(jnp.abs(y - y_ref)))
  assert max_err < 5e-3, f"ConvNeXtBlock mismatch vs reference: {max_err}"

  # also exercise the auto block_b path (single grid step for this shape)
  y2 = jax.block_until_ready(convnext_block_forward(params, x))
  assert float(jnp.max(jnp.abs(y2 - y_ref))) < 5e-3

  print("KERNEL_OK")
</pallas_src>

<mosaic_0001>
module attributes {stable_mosaic.version = 11 : i64} {
  func.func @_convnext_kernel(%arg0: i32, %arg1: memref<2x22x32xf32, #tpu.memory_space<vmem>>, %arg2: memref<7x32xf32, #tpu.memory_space<vmem>>, %arg3: memref<2x32xf32, #tpu.memory_space<vmem>>, %arg4: memref<32x96xf32, #tpu.memory_space<vmem>>, %arg5: memref<1x96xf32, #tpu.memory_space<vmem>>, %arg6: memref<96x32xf32, #tpu.memory_space<vmem>>, %arg7: memref<2x16x32xf32, #tpu.memory_space<vmem>>) attributes {dimension_semantics = [#tpu.dimension_semantics<parallel>], iteration_bounds = array<i64: 2>, scalar_prefetch = 0 : i64, scratch_operands = 0 : i64, tpu.core_type = #tpu.core_type<tc>, window_params = [{transform_indices = @transform_0, window_bounds = array<i64: 2, 22, 32>}, {pipeline_mode = #tpu.pipeline_mode<synchronous>, transform_indices = @transform_1, window_bounds = array<i64: 7, 32>}, {pipeline_mode = #tpu.pipeline_mode<synchronous>, transform_indices = @transform_2, window_bounds = array<i64: 2, 32>}, {pipeline_mode = #tpu.pipeline_mode<synchronous>, transform_indices = @transform_3, window_bounds = array<i64: 32, 96>}, {pipeline_mode = #tpu.pipeline_mode<synchronous>, transform_indices = @transform_4, window_bounds = array<i64: 1, 96>}, {pipeline_mode = #tpu.pipeline_mode<synchronous>, transform_indices = @transform_5, window_bounds = array<i64: 96, 32>}, {transform_indices = @transform_6, window_bounds = array<i64: 2, 16, 32>}]} {
    %c0 = arith.constant 0 : index
    %c0_0 = arith.constant 0 : index
    %c0_1 = arith.constant 0 : index
    %0 = vector.load %arg1[%c0, %c0_0, %c0_1] : memref<2x22x32xf32, #tpu.memory_space<vmem>>, vector<2x22x32xf32>
    %c0_2 = arith.constant 0 : index
    %c0_3 = arith.constant 0 : index
    %1 = vector.load %arg2[%c0_2, %c0_3] : memref<7x32xf32, #tpu.memory_space<vmem>>, vector<7x32xf32>
    %c0_4 = arith.constant 0 : index
    %c0_5 = arith.constant 0 : index
    %2 = vector.load %arg3[%c0_4, %c0_5] : memref<2x32xf32, #tpu.memory_space<vmem>>, vector<2x32xf32>
    %3 = vector.extract_strided_slice %2 {offsets = [0, 0], sizes = [1, 32], strides = [1, 1]} : vector<2x32xf32> to vector<1x32xf32>
    %4 = vector.extract_strided_slice %2 {offsets = [1, 0], sizes = [1, 32], strides = [1, 1]} : vector<2x32xf32> to vector<1x32xf32>
    %5 = vector.extract_strided_slice %0 {offsets = [0, 0, 0], sizes = [2, 16, 32], strides = [1, 1, 1]} : vector<2x22x32xf32> to vector<2x16x32xf32>
    %6 = vector.extract_strided_slice %1 {offsets = [0, 0], sizes = [1, 32], strides = [1, 1]} : vector<7x32xf32> to vector<1x32xf32>
    %7 = vector.shape_cast %6 : vector<1x32xf32> to vector<1x1x32xf32>
    %8 = vector.broadcast %7 : vector<1x1x32xf32> to vector<2x16x32xf32>
    %9 = arith.mulf %5, %8 : vector<2x16x32xf32>
    %10 = vector.extract_strided_slice %0 {offsets = [0, 1, 0], sizes = [2, 16, 32], strides = [1, 1, 1]} : vector<2x22x32xf32> to vector<2x16x32xf32>
    %11 = vector.extract_strided_slice %1 {offsets = [1, 0], sizes = [1, 32], strides = [1, 1]} : vector<7x32xf32> to vector<1x32xf32>
    %12 = vector.shape_cast %11 : vector<1x32xf32> to vector<1x1x32xf32>
    %13 = vector.broadcast %12 : vector<1x1x32xf32> to vector<2x16x32xf32>
    %14 = arith.mulf %10, %13 : vector<2x16x32xf32>
    %15 = arith.addf %9, %14 : vector<2x16x32xf32>
    %16 = vector.extract_strided_slice %0 {offsets = [0, 2, 0], sizes = [2, 16, 32], strides = [1, 1, 1]} : vector<2x22x32xf32> to vector<2x16x32xf32>
    %17 = vector.extract_strided_slice %1 {offsets = [2, 0], sizes = [1, 32], strides = [1, 1]} : vector<7x32xf32> to vector<1x32xf32>
    %18 = vector.shape_cast %17 : vector<1x32xf32> to vector<1x1x32xf32>
    %19 = vector.broadcast %18 : vector<1x1x32xf32> to vector<2x16x32xf32>
    %20 = arith.mulf %16, %19 : vector<2x16x32xf32>
    %21 = arith.addf %15, %20 : vector<2x16x32xf32>
    %22 = vector.extract_strided_slice %0 {offsets = [0, 3, 0], sizes = [2, 16, 32], strides = [1, 1, 1]} : vector<2x22x32xf32> to vector<2x16x32xf32>
    %23 = vector.extract_strided_slice %1 {offsets = [3, 0], sizes = [1, 32], strides = [1, 1]} : vector<7x32xf32> to vector<1x32xf32>
    %24 = vector.shape_cast %23 : vector<1x32xf32> to vector<1x1x32xf32>
    %25 = vector.broadcast %24 : vector<1x1x32xf32> to vector<2x16x32xf32>
    %26 = arith.mulf %22, %25 : vector<2x16x32xf32>
    %27 = arith.addf %21, %26 : vector<2x16x32xf32>
    %28 = vector.extract_strided_slice %0 {offsets = [0, 4, 0], sizes = [2, 16, 32], strides = [1, 1, 1]} : vector<2x22x32xf32> to vector<2x16x32xf32>
    %29 = vector.extract_strided_slice %1 {offsets = [4, 0], sizes = [1, 32], strides = [1, 1]} : vector<7x32xf32> to vector<1x32xf32>
    %30 = vector.shape_cast %29 : vector<1x32xf32> to vector<1x1x32xf32>
    %31 = vector.broadcast %30 : vector<1x1x32xf32> to vector<2x16x32xf32>
    %32 = arith.mulf %28, %31 : vector<2x16x32xf32>
    %33 = arith.addf %27, %32 : vector<2x16x32xf32>
    %34 = vector.extract_strided_slice %0 {offsets = [0, 5, 0], sizes = [2, 16, 32], strides = [1, 1, 1]} : vector<2x22x32xf32> to vector<2x16x32xf32>
    %35 = vector.extract_strided_slice %1 {offsets = [5, 0], sizes = [1, 32], strides = [1, 1]} : vector<7x32xf32> to vector<1x32xf32>
    %36 = vector.shape_cast %35 : vector<1x32xf32> to vector<1x1x32xf32>
    %37 = vector.broadcast %36 : vector<1x1x32xf32> to vector<2x16x32xf32>
    %38 = arith.mulf %34, %37 : vector<2x16x32xf32>
    %39 = arith.addf %33, %38 : vector<2x16x32xf32>
    %40 = vector.extract_strided_slice %0 {offsets = [0, 6, 0], sizes = [2, 16, 32], strides = [1, 1, 1]} : vector<2x22x32xf32> to vector<2x16x32xf32>
    %41 = vector.extract_strided_slice %1 {offsets = [6, 0], sizes = [1, 32], strides = [1, 1]} : vector<7x32xf32> to vector<1x32xf32>
    %42 = vector.shape_cast %41 : vector<1x32xf32> to vector<1x1x32xf32>
    %43 = vector.broadcast %42 : vector<1x1x32xf32> to vector<2x16x32xf32>
    %44 = arith.mulf %40, %43 : vector<2x16x32xf32>
    %45 = arith.addf %39, %44 : vector<2x16x32xf32>
    %46 = vector.shape_cast %3 : vector<1x32xf32> to vector<1x1x32xf32>
    %47 = vector.broadcast %46 : vector<1x1x32xf32> to vector<2x16x32xf32>
    %48 = arith.addf %45, %47 : vector<2x16x32xf32>
    %49 = vector.shape_cast %48 : vector<2x16x32xf32> to vector<32x32xf32>
    %cst = arith.constant dense<0.000000e+00> : vector<32xf32>
    %50 = vector.multi_reduction <add>, %49, %cst [1] : vector<32x32xf32> to vector<32xf32>
    %51 = vector.shape_cast %50 : vector<32xf32> to vector<32x1xf32>
    %cst_6 = arith.constant 3.200000e+01 : f32
    %52 = vector.broadcast %cst_6 : f32 to vector<32x1xf32>
    %53 = arith.divf %51, %52 : vector<32x1xf32>
    %54 = vector.broadcast %53 : vector<32x1xf32> to vector<32x32xf32>
    %55 = arith.subf %49, %54 : vector<32x32xf32>
    %56 = arith.mulf %55, %55 : vector<32x32xf32>
    %cst_7 = arith.constant dense<0.000000e+00> : vector<32xf32>
    %57 = vector.multi_reduction <add>, %56, %cst_7 [1] : vector<32x32xf32> to vector<32xf32>
    %58 = vector.shape_cast %57 : vector<32xf32> to vector<32x1xf32>
    %cst_8 = arith.constant 3.200000e+01 : f32
    %59 = vector.broadcast %cst_8 : f32 to vector<32x1xf32>
    %60 = arith.divf %58, %59 : vector<32x1xf32>
    %cst_9 = arith.constant 9.99999997E-7 : f32
    %61 = vector.broadcast %cst_9 : f32 to vector<32x1xf32>
    %62 = arith.addf %60, %61 : vector<32x1xf32>
    %63 = math.rsqrt %62 : vector<32x1xf32>
    %64 = vector.broadcast %63 : vector<32x1xf32> to vector<32x32xf32>
    %65 = arith.mulf %55, %64 : vector<32x32xf32>
    %c0_10 = arith.constant 0 : index
    %c0_11 = arith.constant 0 : index
    %66 = vector.load %arg4[%c0_10, %c0_11] : memref<32x96xf32, #tpu.memory_space<vmem>>, vector<32x96xf32>
    %cst_12 = arith.constant dense<0.000000e+00> : vector<32x96xf32>
    %67 = tpu.matmul %65, %66, %cst_12 {dimension_numbers = #tpu.dot_dimension_numbers<[1], [0], [0], [1], [0, 0, 1, 1], [], []>} : vector<32x32xf32>, vector<32x96xf32>, vector<32x96xf32> -> vector<32x96xf32>
    %c0_13 = arith.constant 0 : index
    %c0_14 = arith.constant 0 : index
    %68 = vector.load %arg5[%c0_13, %c0_14] : memref<1x96xf32, #tpu.memory_space<vmem>>, vector<1x96xf32>
    %69 = vector.broadcast %68 : vector<1x96xf32> to vector<32x96xf32>
    %70 = arith.addf %67, %69 : vector<32x96xf32>
    %cst_15 = arith.constant 5.000000e-01 : f32
    %71 = vector.broadcast %cst_15 : f32 to vector<32x96xf32>
    %72 = arith.mulf %71, %70 : vector<32x96xf32>
    %cst_16 = arith.constant 4.471500e-02 : f32
    %73 = vector.broadcast %cst_16 : f32 to vector<32x96xf32>
    %74 = arith.mulf %73, %70 : vector<32x96xf32>
    %75 = arith.mulf %74, %70 : vector<32x96xf32>
    %76 = arith.mulf %75, %70 : vector<32x96xf32>
    %77 = arith.addf %70, %76 : vector<32x96xf32>
    %cst_17 = arith.constant 0.797884583 : f32
    %78 = vector.broadcast %cst_17 : f32 to vector<32x96xf32>
    %79 = arith.mulf %78, %77 : vector<32x96xf32>
    %80 = math.tanh %79 : vector<32x96xf32>
    %cst_18 = arith.constant 1.000000e+00 : f32
    %81 = vector.broadcast %cst_18 : f32 to vector<32x96xf32>
    %82 = arith.addf %81, %80 : vector<32x96xf32>
    %83 = arith.mulf %72, %82 : vector<32x96xf32>
    %c0_19 = arith.constant 0 : index
    %c0_20 = arith.constant 0 : index
    %84 = vector.load %arg6[%c0_19, %c0_20] : memref<96x32xf32, #tpu.memory_space<vmem>>, vector<96x32xf32>
    %cst_21 = arith.constant dense<0.000000e+00> : vector<32x32xf32>
    %85 = tpu.matmul %83, %84, %cst_21 {dimension_numbers = #tpu.dot_dimension_numbers<[1], [0], [0], [1], [0, 0, 1, 1], [], []>} : vector<32x96xf32>, vector<96x32xf32>, vector<32x32xf32> -> vector<32x32xf32>
    %86 = vector.broadcast %4 : vector<1x32xf32> to vector<32x32xf32>
    %87 = arith.addf %85, %86 : vector<32x32xf32>
    %88 = vector.extract_strided_slice %0 {offsets = [0, 3, 0], sizes = [2, 16, 32], strides = [1, 1, 1]} : vector<2x22x32xf32> to vector<2x16x32xf32>
    %89 = vector.shape_cast %87 : vector<32x32xf32> to vector<2x16x32xf32>
    %90 = arith.addf %88, %89 : vector<2x16x32xf32>
    %c0_22 = arith.constant 0 : index
    %c0_23 = arith.constant 0 : index
    %c0_24 = arith.constant 0 : index
    %91 = vector.load %arg7[%c0_22, %c0_23, %c0_24] : memref<2x16x32xf32, #tpu.memory_space<vmem>>, vector<2x16x32xf32>
    tpu.vector_store %arg7[%c0_22, %c0_23, %c0_24], %90 {strides = array<i32>} : memref<2x16x32xf32, #tpu.memory_space<vmem>>, vector<2x16x32xf32>,
    return
  }
  func.func @transform_0(%arg0: i32) -> (i32, i32, i32) {
    %c0_i32 = arith.constant 0 : i32
    %c0_i32_0 = arith.constant 0 : i32
    %c0_i32_1 = arith.constant 0 : i32
    return %arg0, %c0_i32, %c0_i32_0 : i32, i32, i32
  }
  func.func @transform_1(%arg0: i32) -> (i32, i32) {
    %c0_i32 = arith.constant 0 : i32
    %c0_i32_0 = arith.constant 0 : i32
    %c0_i32_1 = arith.constant 0 : i32
    return %c0_i32, %c0_i32_0 : i32, i32
  }
  func.func @transform_2(%arg0: i32) -> (i32, i32) {
    %c0_i32 = arith.constant 0 : i32
    %c0_i32_0 = arith.constant 0 : i32
    %c0_i32_1 = arith.constant 0 : i32
    return %c0_i32, %c0_i32_0 : i32, i32
  }
  func.func @transform_3(%arg0: i32) -> (i32, i32) {
    %c0_i32 = arith.constant 0 : i32
    %c0_i32_0 = arith.constant 0 : i32
    %c0_i32_1 = arith.constant 0 : i32
    return %c0_i32, %c0_i32_0 : i32, i32
  }
  func.func @transform_4(%arg0: i32) -> (i32, i32) {
    %c0_i32 = arith.constant 0 : i32
    %c0_i32_0 = arith.constant 0 : i32
    %c0_i32_1 = arith.constant 0 : i32
    return %c0_i32, %c0_i32_0 : i32, i32
  }
  func.func @transform_5(%arg0: i32) -> (i32, i32) {
    %c0_i32 = arith.constant 0 : i32
    %c0_i32_0 = arith.constant 0 : i32
    %c0_i32_1 = arith.constant 0 : i32
    return %c0_i32, %c0_i32_0 : i32, i32
  }
  func.func @transform_6(%arg0: i32) -> (i32, i32, i32) {
    %c0_i32 = arith.constant 0 : i32
    %c0_i32_0 = arith.constant 0 : i32
    %c0_i32_1 = arith.constant 0 : i32
    return %arg0, %c0_i32, %c0_i32_0 : i32, i32, i32
  }
}

</mosaic_0001>

<bundles_post_ra>
// kernel: convnext_block_forward.1
= control target key start
LH: loop header
LB: loop body
LE: loop exit
PB: predicated region body
PF: predicated region fallthrough
CT: control target
= control target key end

     0   :  { %11 = vsyncpa [#allocation3], 0  ;;  %s1439_s0 = inlined_call_operand.vmem [shape: f32[4,22,32], index: 0, kind: input, shape index: {}]   ;;  %s1440_s1 = inlined_call_operand.vmem [shape: f32[7,32], index: 1, kind: input, shape index: {}]   ;;  %s1441_s2 = inlined_call_operand.vmem [shape: f32[2,32], index: 2, kind: input, shape index: {}]   ;;  %s1442_s3 = inlined_call_operand.vmem [shape: f32[32,96], index: 3, kind: input, shape index: {}]   ;;  %s1443_s4 = inlined_call_operand.vmem [shape: f32[1,96], index: 4, kind: input, shape index: {}]   ;;  %s1444_s5 = inlined_call_operand.vmem [shape: f32[96,32], index: 5, kind: input, shape index: {}]   ;;  %s1445_s6 = inlined_call_operand.hbm [shape: f32[4,16,32], index: 6, kind: output, shape index: {}]  }
   0x1   :  { %13 = vsyncpa [#allocation3 + $0x1], 0  ;;  %s1022_s21 = smov 0   ;;  %s1024_s22 = smov 0  }
   0x2   :  { %s1026_s23 = smov 0   ;;  %s1028_s24 = smov 0  }
   0x3 LB: > { %s1043_s25 = sadd.s32 4294967295, %s982_s24   ;;  %s811_s26 = sadd.s32 4294967294, %s982_s24   ;;  %s982_s24 = sphi %s1028_s24, %s1451_s24   ;;  %s978_s23 = sphi %s1026_s23, %s1450_s23   ;;  %s974_s22 = sphi %s1024_s22, %s1449_s22   ;;  %s970_s21 = sphi %s1022_s21, %s1448_s21  }
   0x4   : > { %s1047_s27 = sadd.s32 1, %s982_s24   ;;  %s157_s28 = sadd.s32 1, %s978_s23 }
   0x5   : > { %s154_s29 = ssub.s32 %s982_s24, %s1047_s27  ;;  %p167_p0 = scmp.ne.s32.totalorder %s978_s23, %s974_s22 }
   0x6   : > { %p155_p1 = scmp.eq.s32.totalorder %s154_s29, 0  ;;  %p168_p2 = scmp.eq.s32.totalorder %s1043_s25, 1 }
   0x7   : > { %p173_p3 = scmp.ne.s32.totalorder %s974_s22, %s970_s21  ;;  %p174_p4 = scmp.eq.s32.totalorder %s811_s26, 1 }
   0x8   : > { %s1058_s30 = scalar_select %p155_p1, %s978_s23, %s157_s28  }
   0x9   : > { %p1060_p5 = por %p168_p2, %p167_p0  ;;  %p1064_p6 = por %p174_p4, %p173_p3 }
   0xa   : > { %p814_p7 = scmp.ge.s32.totalorder %s982_s24, 1  ;;  %p217_p8 = scmp.lt.s32.totalorder %s982_s24, 3 }
   0xc   : > { %p218_p9 = pnand %p814_p7, %p217_p8 }
   0xd   : > { %s816_s9 = sshll.u32 (!%p218_p9), %s1043_s25, 1  ;;  %s245_s28 = sand.u32 (!%p218_p9), 1, %s974_s22  }
   0xe   : > { %221 = sbr.rel (%p218_p9) target bundleno = 639 (0x27f), region = 44  ;;  %p249_p10 = scmp.lt.s32.totalorder (!%p218_p9), %s816_s9, 3 }
   0xf   : > { %s815_s29 = sshll.u32 (!%p218_p9), %s245_s28, 5  ;;  %s833_s10 = sshll.u32 (!%p218_p9), %s1043_s25, 5 }
  0x10   : > { %s745_s13 = scalar_lea.hbm (!%p218_p9), %s1445_s6, %s833_s10  ;;  %s733_s25 = scalar_lea.sflag (!%p218_p9), [#allocation3], %s245_s28 }
  0x11   : > { %s748_s15 = sshll.u32 (!%p218_p9), %s745_s13, 4  ;;  %s940_s20 = scalar_lea.hbm (!%p218_p9), %s1445_s6, 64  ;;  %s749_s15 = int_to_ptr.hbm [resolvable:$true] %s748_s15 }
  0x12   : > { %s934_s16 = sshra.s32 (!%p218_p9), %s749_s15, 4  ;;  %s935_s16 = int_to_ptr.hbm [resolvable:$true] %s934_s16 }
  0x13   : > { %v262_v0 = vld [vmem:[%s1440_s1] sm:$0x7f]  ;;  %s1453_s9 = smov (!%p249_p10, %s816_s9), 3  ;;  %vm282_vm0 = vcmask 1046528   ;;  %vm314_vm1 = vcmask 1045504   ;;  %vm346_vm2 = vcmask 1044480   ;;  %p941_p0 = scmp.lt.s32.totalorder %s935_s16, %s1445_s6 }
  0x14   : > { %s858_s12 = smul.u32 24, %s1453_s9  ;;  %v1077_v1 = vld [vmem:[%s1441_s2] sm:$0x3]  ;;  %v1079_v2 = vperm.slane %v262_v0, 0  ;;  %v1081_v3 = vperm.slane %v262_v0, 1  ;;  %v1083_v4 = vperm.slane %v262_v0, 2 }
  0x15   : > { %v1085_v5 = vperm.slane %v262_v0, 3  ;;  %v1087_v6 = vperm.slane %v262_v0, 4  ;;  %vm378_vm3 = vcmask 1043456   ;;  %v1094_v7 = vperm.slane %v262_v0, 5  ;;  %s247_s9 = scalar_lea.vmem [#allocation2], %s815_s29 }
  0x16   : > { %s1092_s17 = scalar_lea.vmem %s1439_s0, %s858_s12  ;;  %vm410_vm4 = vcmask 1042432   ;;  %v1102_v10 = vperm.slane %v262_v0, 6  ;;  %vm442_vm5 = vcmask 1041408   ;;  %v1105_v11 = vperm.slane %v1077_v1, 0  ;;  %s746_s14 = sshll.u32 %s247_s9, 4  ;;  %s747_s14 = int_to_ptr.vmem [resolvable:$true] %s746_s14 }
  0x17   : > { %v1097_v8 = vld [vmem:[%s1092_s17 + $0x18] sm:$0xff]  ;;  %v1100_v9 = vld [vmem:[%s1092_s17 + $0x20] sm:$0xff]  ;;  %v1158_v37 = vld [vmem:[%s1092_s17 + $0x8] sm:$0xff]  ;;  %vm466_vm6 = vcmask 261120  }
  0x18   : > { %v267_v12 = vmul.f32 %v1079_v2, %v1097_v8  ;;  %v273_v13 = vmul.f32 %v1081_v3, %v1097_v8  ;;  %v1113_v14 = vmul.f32 %v1081_v3, %v1100_v9  ;;  %v305_v15 = vmul.f32 %v1083_v4, %v1097_v8  ;;  %v1147_v32 = vld [vmem:[%s1092_s17] sm:$0xff] }
  0x19   : > { %v1119_v16 = vmul.f32 %v1083_v4, %v1100_v9  ;;  %v337_v17 = vmul.f32 %v1085_v5, %v1097_v8  ;;  %v1125_v18 = vmul.f32 %v1085_v5, %v1100_v9  ;;  %v369_v19 = vmul.f32 %v1087_v6, %v1097_v8 }
  0x1a   : > { %v288_v20 = vrot.slane %v273_v13, 1  ;;  %v289_v21 = vrot.slane %v1113_v14, 1  ;;  %v320_v22 = vrot.slane %v305_v15, 2  ;;  %v1132_v23 = vmul.f32 %v1087_v6, %v1100_v9 }
  0x1b   : > { %v321_v24 = vrot.slane %v1119_v16, 2  ;;  %v352_v25 = vrot.slane %v337_v17, 3  ;;  %v353_v26 = vrot.slane %v1125_v18, 3  ;;  %v384_v27 = vrot.slane %v369_v19, 4 }
  0x1c   : > { %v290_v28 = vsel %vm282_vm0, %v288_v20, %v289_v21  ;;  %v385_v29 = vrot.slane %v1132_v23, 4  ;;  %v401_v30 = vmul.f32 %v1094_v7, %v1097_v8  ;;  %v1144_v31 = vmul.f32 %v1094_v7, %v1100_v9  ;;  %v1213_v20 = vld [vmem:[%s1092_s17 + $0x28] sm:$0x3f] }
  0x1d   : > { %v299_v33 = vadd.f32 %v290_v28, %v267_v12  ;;  %v322_v34 = vsel %vm314_vm1, %v320_v22, %v321_v24  ;;  %v354_v35 = vsel %vm346_vm2, %v352_v25, %v353_v26  ;;  %v433_v36 = vmul.f32 %v1102_v10, %v1097_v8 }
  0x1e   : > { %v386_v38 = vsel %vm378_vm3, %v384_v27, %v385_v29  ;;  %v416_v39 = vrot.slane %v401_v30, 5  ;;  %v417_v40 = vrot.slane %v1144_v31, 5  ;;  %v1166_v41 = vmul.f32 %v1102_v10, %v1100_v9 }
  0x1f   : > { %v331_v42 = vadd.f32 %v322_v34, %v299_v33  ;;  %v448_v43 = vrot.slane %v433_v36, 6  ;;  %v265_v44 = vmul.f32 %v1079_v2, %v1147_v32  ;;  %v270_v45 = vmul.f32 %v1081_v3, %v1147_v32 }
  0x20   : > { %v418_v46 = vsel %vm410_vm4, %v416_v39, %v417_v40  ;;  %v449_v47 = vrot.slane %v1166_v41, 6  ;;  %v1178_v48 = vmul.f32 %v1081_v3, %v1158_v37  ;;  %v302_v49 = vmul.f32 %v1083_v4, %v1147_v32 }
  0x21   : > { %v363_v50 = vadd.f32 %v354_v35, %v331_v42  ;;  %v283_v51 = vrot.slane %v270_v45, 1  ;;  %v1184_v52 = vmul.f32 %v1083_v4, %v1158_v37  ;;  %v334_v53 = vmul.f32 %v1085_v5, %v1147_v32 }
  0x22   : > { %v450_v54 = vsel %vm442_vm5, %v448_v43, %v449_v47  ;;  %v284_v55 = vrot.slane %v1178_v48, 1  ;;  %v315_v56 = vrot.slane %v302_v49, 2  ;;  %v1194_v57 = vmul.f32 %v1085_v5, %v1158_v37 }
  0x23   : > { %v395_v58 = vadd.f32 %v386_v38, %v363_v50  ;;  %v316_v59 = vrot.slane %v1184_v52, 2  ;;  %v347_v60 = vrot.slane %v334_v53, 3  ;;  %v366_v61 = vmul.f32 %v1087_v6, %v1147_v32 }
  0x24   : > { %v285_v62 = vsel %vm282_vm0, %v283_v51, %v284_v55  ;;  %v348_v63 = vrot.slane %v1194_v57, 3  ;;  %v1205_v0 = vmul.f32 %v1087_v6, %v1158_v37  ;;  %v398_v12 = vmul.f32 %v1094_v7, %v1147_v32 }
  0x25   : > { %v427_v13 = vadd.f32 %v418_v46, %v395_v58  ;;  %v297_v15 = vadd.f32 %v285_v62, %v265_v44  ;;  %v317_v17 = vsel %vm314_vm1, %v315_v56, %v316_v59  ;;  %v379_v19 = vrot.slane %v366_v61, 4 }
  0x26   : > { %v349_v22 = vsel %vm346_vm2, %v347_v60, %v348_v63  ;;  %v380_v25 = vrot.slane %v1205_v0, 4  ;;  %v1221_v27 = vmul.f32 %v1094_v7, %v1158_v37  ;;  %v411_v28 = vrot.slane %v398_v12, 5 }
  0x27   : > { %v459_v30 = vadd.f32 %v450_v54, %v427_v13  ;;  %v329_v33 = vadd.f32 %v317_v17, %v297_v15  ;;  %v430_v34 = vmul.f32 %v1102_v10, %v1147_v32  ;;  %v1227_v35 = vmul.f32 %v1102_v10, %v1158_v37 }
  0x28   : > { %v381_v36 = vsel %vm378_vm3, %v379_v19, %v380_v25  ;;  %v412_v38 = vrot.slane %v1221_v27, 5  ;;  %v268_v39 = vmul.f32 %v1079_v2, %v1100_v9  ;;  %v275_v42 = vmul.f32 %v1081_v3, %v1213_v20 }
  0x29   : > { %v1238_v43 = vadd.f32 %v1105_v11, %v459_v30  ;;  %v361_v44 = vadd.f32 %v349_v22, %v329_v33  ;;  %v443_v45 = vrot.slane %v430_v34, 6  ;;  %v444_v46 = vrot.slane %v1227_v35, 6 }
  0x2a   : > { %v413_v49 = vsel %vm410_vm4, %v411_v28, %v412_v38  ;;  %v291_v50 = vrot.slane %v275_v42, 1  ;;  %v307_v51 = vmul.f32 %v1083_v4, %v1213_v20  ;;  %v339_v53 = vmul.f32 %v1085_v5, %v1213_v20  ;;  %v1261_v28 = vld [vmem:[%s1092_s17 + $0x10] sm:$0x3f]  ;;  %s936_s17 = scalar_lea.hbm %s935_s16, 32 }
  0x2b   : > { %v473_v54 = vsel %vm466_vm6, %v1238_v43, 0.0  ;;  %v393_v56 = vadd.f32 %v381_v36, %v361_v44  ;;  %v445_v58 = vsel %vm442_vm5, %v443_v45, %v444_v46  ;;  %v371_v60 = vmul.f32 %v1087_v6, %v1213_v20  ;;  %p937_p11 = scmp.ne.s32.totalorder %s935_s16, %s936_s17  ;;  %p942_p1 = scmp.lt.s32.totalorder %s940_s20, %s936_s17 }
  0x2c   : > { %474 = vadd.xlane.f32.xlu1 %v473_v54  ;;  %v292_v61 = vsel %vm282_vm0, %v289_v21, %v291_v50  ;;  %v323_v62 = vrot.slane %v307_v51, 2  ;;  %v355_v12 = vrot.slane %v339_v53, 3  ;;  %v403_v13 = vmul.f32 %v1094_v7, %v1213_v20 }
  0x2d   : > { %v425_v15 = vadd.f32 %v413_v49, %v393_v56  ;;  %v300_v17 = vadd.f32 %v292_v61, %v268_v39  ;;  %v387_v19 = vrot.slane %v371_v60, 4  ;;  %v435_v22 = vmul.f32 %v1102_v10, %v1213_v20  ;;  %p938_p12 = pnand %p937_p11, %p1060_p5  ;;  %p943_p2 = por %p942_p1, %p941_p0 }
  0x2e   : > { %v324_v30 = vsel %vm314_vm1, %v321_v24, %v323_v62  ;;  %v356_v14 = vsel %vm346_vm2, %v353_v26, %v355_v12  ;;  %v419_v21 = vrot.slane %v403_v13, 5  ;;  %v266_v36 = vmul.f32 %v1079_v2, %v1158_v37 }
  0x2f   : > { %v457_v33 = vadd.f32 %v445_v58, %v425_v15  ;;  %v332_v34 = vadd.f32 %v324_v30, %v300_v17  ;;  %v451_v35 = vrot.slane %v435_v22, 6  ;;  %v388_v39 = vsel %vm378_vm3, %v385_v29, %v387_v19  ;;  %p939_p13 = pneg %p938_p12 }
  0x30   : > { %v272_v16 = vmul.f32 %v1081_v3, %v1261_v28  ;;  %v304_v24 = vmul.f32 %v1083_v4, %v1261_v28  ;;  %v336_v18 = vmul.f32 %v1085_v5, %v1261_v28  ;;  %v420_v2 = vsel %vm410_vm4, %v417_v40, %v419_v21 }
  0x31   : > { %v462_v26 = vadd.f32 %v1105_v11, %v457_v33  ;;  %v364_v42 = vadd.f32 %v356_v14, %v332_v34  ;;  %v368_v23 = vmul.f32 %v1087_v6, %v1261_v28  ;;  %v400_v3 = vmul.f32 %v1094_v7, %v1261_v28  ;;  %p944_p3 = pnand %p943_p2, %p939_p13 }
  0x32   : > { %v286_v29 = vrot.slane %v272_v16, 1  ;;  %v318_v44 = vrot.slane %v304_v24, 2  ;;  %v350_v45 = vrot.slane %v336_v18, 3  ;;  %v452_v5 = vsel %vm442_vm5, %v449_v47, %v451_v35 }
  0x33   : > { %v467_v4 = vsel %vm466_vm6, %v462_v26, 0.0  ;;  %v396_v49 = vadd.f32 %v388_v39, %v364_v42  ;;  %v382_v40 = vrot.slane %v368_v23, 4  ;;  %v432_v7 = vmul.f32 %v1102_v10, %v1261_v28  ;;  %v565_v23 = vld [vmem:[%s1442_s3 + $0x18] sm:$0xff] }
  0x34   : > { %468 = vadd.xlane.f32.xlu0 %v467_v4  ;;  %v287_v31 = vsel %vm282_vm0, %v284_v55, %v286_v29  ;;  %v319_v6 = vsel %vm314_vm1, %v316_v59, %v318_v44  ;;  %v351_v41 = vsel %vm346_vm2, %v348_v63, %v350_v45  ;;  %v414_v47 = vrot.slane %v400_v3, 5  ;;  %594 = vmatpush.msra.mxu0 %v565_v23  ;;  %v564_v29 = vld [vmem:[%s1442_s3 + $0x10] sm:$0xff]  ;;  %v563_v44 = vld [vmem:[%s1442_s3 + $0x8] sm:$0xff]  ;;  %v562_v45 = vld [vmem:[%s1442_s3] sm:$0xff] }
  0x35   : > { %v428_v50 = vadd.f32 %v420_v2, %v396_v49  ;;  %v298_v51 = vadd.f32 %v287_v31, %v266_v36  ;;  %v383_v48 = vsel %vm378_vm3, %v380_v25, %v382_v40  ;;  %v446_v52 = vrot.slane %v432_v7, 6  ;;  %v649_v23 = vld [vmem:[%s1444_s5 + $0x10] sm:$0xff] }
  0x36   : > { %v415_v10 = vsel %vm410_vm4, %v412_v38, %v414_v47  ;;  %v984_v61 = vmov 32.0   ;;  %595 = vmatpush.msra.mxu0 %v564_v29  ;;  %v648_v29 = vld [vmem:[%s1444_s5 + $0x8] sm:$0xff] }
  0x37   : > { %v460_v53 = vadd.f32 %v452_v5, %v428_v50  ;;  %v330_v54 = vadd.f32 %v319_v6, %v298_v51  ;;  %v447_v63 = vsel %vm442_vm5, %v444_v46, %v446_v52  ;;  %902 = vrcp.f32 %v984_v61 }
  0x38   : > { %596 = vmatpush.msra.mxu0 %v563_v44  ;;  %v647_v44 = vld [vmem:[%s1444_s5] sm:$0xff]  ;;  %vm660_vm5 = vcmask 785408  }
  0x39   : > { %v465_v55 = vadd.f32 %v1105_v11, %v460_v53  ;;  %v362_v59 = vadd.f32 %v351_v41, %v330_v54 }
  0x3a   : > { %597 = vmatpush.msra.mxu0 %v562_v45  ;;  %v901_v45 = vld [vmem:[%s1443_s4] ss:$0 sm:$0xff] }
  0x3b   : > { %v476_v56 = vsel %vm466_vm6, %v465_v55, 0.0  ;;  %v394_v57 = vadd.f32 %v383_v48, %v362_v59 }
  0x3c   : > { %477 = vadd.xlane.f32.xlu1 %v476_v56 }
  0x3d   : > { %v426_v58 = vadd.f32 %v415_v10, %v394_v57  ;;  %v903_v62 = vpop.eup %902 }
  0x3e   : > { %v480_v12 = vmul.f32 32.0, %v903_v62  ;;  %vm484_vm7 = vweird.f32 %v903_v62 }
  0x3f   : > { %v458_v60 = vadd.f32 %v447_v63, %v426_v58 }
  0x40   : > { %v481_v27 = vsub.f32 1.0, %v480_v12 }
  0x41   : > { %v463_v0 = vadd.f32 %v1105_v11, %v458_v60 }
  0x42   : > { %v482_v13 = vmul.f32 %v903_v62, %v481_v27 }
  0x43   : > { %v470_v25 = vsel %vm466_vm6, %v463_v0, 0.0 }
  0x44   : > { %471 = vadd.xlane.f32.xlu0 %v470_v25  ;;  %v483_v38 = vadd.f32 %v903_v62, %v482_v13 }
  0x46   : > { %v485_v15 = vsel %vm484_vm7, %v903_v62, %v483_v38  ;;  %vm724_vm7 = vcmask 261123  }
  0x9f   : > { %v475_v17 = vpop.xlane.xlu1 %474 }
  0xa0   : > { %v488_v19 = vmul.f32 %v485_v15, %v475_v17 }
  0xa2   : > { %v1315_v46 = vsub.f32 %v1238_v43, %v488_v19 }
  0xa4   : > { %v496_v11 = vmul.f32 %v1315_v46, %v1315_v46 }
  0xa6   : > { %v504_v22 = vsel %vm466_vm6, %v496_v11, 0.0 }
  0xa7   : > { %v469_v30 = vpop.xlane.xlu0 %468  ;;  %505 = vadd.xlane.f32.xlu0 %v504_v22 }
  0xa8   : > { %v486_v14 = vmul.f32 %v485_v15, %v469_v30 }
  0xaa   : > { %v490_v21 = vsub.f32 %v462_v26, %v486_v14 }
  0xac   : > { %v494_v33 = vmul.f32 %v490_v21, %v490_v21 }
  0xae   : > { %v498_v34 = vsel %vm466_vm6, %v494_v33, 0.0 }
  0xaf   : > { %v478_v35 = vpop.xlane.xlu1 %477  ;;  %499 = vadd.xlane.f32.xlu2 %v498_v34 }
  0xb0   : > { %v489_v36 = vmul.f32 %v485_v15, %v478_v35 }
  0xb2   : > { %v1321_v39 = vsub.f32 %v465_v55, %v489_v36 }
  0xb4   : > { %v497_v43 = vmul.f32 %v1321_v39, %v1321_v39 }
  0xb6   : > { %v507_v16 = vsel %vm466_vm6, %v497_v43, 0.0  ;;  %v658_v43 = vld [vmem:[%s1444_s5 + $0x58] sm:$0xff] }
  0xb7   : > { %v472_v24 = vpop.xlane.xlu0 %471  ;;  %508 = vadd.xlane.f32.xlu1 %v507_v16  ;;  %v657_v16 = vld [vmem:[%s1444_s5 + $0x50] sm:$0xff]  ;;  %677 = vmatpush.msra.mxu1 %v658_v43 }
  0xb8   : > { %v487_v18 = vmul.f32 %v485_v15, %v472_v24  ;;  %834 = vmatpush.msra.mxu2 %v658_v43  ;;  %835 = vmatpush.msra.mxu3 %v658_v43  ;;  %v654_v24 = vld [vmem:[%s1444_s5 + $0x38] sm:$0xff]  ;;  %v659_v43 = vperm.slane %v1077_v1, 1 }
  0xb9   : > { %678 = vmatpush.msra.mxu1 %v657_v16 }
  0xba   : > { %v491_v42 = vsub.f32 %v463_v0, %v487_v18  ;;  %836 = vmatpush.msra.mxu2 %v657_v16  ;;  %837 = vmatpush.msra.mxu3 %v657_v16  ;;  %v653_v18 = vld [vmem:[%s1444_s5 + $0x30] sm:$0xff] }
  0xbc   : > { %v495_v2 = vmul.f32 %v491_v42, %v491_v42 }
  0xbe   : > { %v501_v26 = vsel %vm466_vm6, %v495_v2, 0.0  ;;  %v651_v2 = vld [vmem:[%s1444_s5 + $0x20] sm:$0xff] }
  0xbf   : > { %502 = vadd.xlane.f32.xlu2 %v501_v26  ;;  %v650_v26 = vld [vmem:[%s1444_s5 + $0x18] sm:$0xff] }
 0x11a   : > { %v506_v5 = vpop.xlane.xlu0 %505 }
 0x11b   : > { %v512_v31 = vmul.f32 %v506_v5, %v485_v15 }
 0x11d   : > { %v516_v40 = vadd.f32 1e-06, %v512_v31 }
 0x11f   : > { %vm544_vm14 = vweird.f32 %v516_v40 }
 0x122   : > { %v500_v3 = vpop.xlane.xlu2 %499 }
 0x123   : > { %v510_v4 = vmul.f32 %v500_v3, %v485_v15 }
 0x125   : > { %v514_v49 = vadd.f32 1e-06, %v510_v4 }
 0x127   : > { %904 = vrsqrt.f32 %v514_v49  ;;  %vm524_vm9 = vweird.f32 %v514_v49 }
 0x128   : > { %906 = vrsqrt.f32 %v516_v40 }
 0x12a   : > { %v509_v50 = vpop.xlane.xlu1 %508 }
 0x12b   : > { %v513_v41 = vmul.f32 %v509_v50, %v485_v15 }
 0x12d   : > { %v905_v6 = vpop.eup %904  ;;  %v517_v52 = vadd.f32 1e-06, %v513_v41 }
 0x12e   : > { %v519_v7 = vmul.f32 %v905_v6, %v514_v49  ;;  %vm525_vm8 = vweird.f32 %v905_v6  ;;  %v907_v10 = vpop.eup %906 }
 0x12f   : > { %vm526_vm10 = vmor %vm524_vm9, %vm525_vm8  ;;  %v539_v63 = vmul.f32 %v907_v10, %v516_v40  ;;  %vm545_vm15 = vweird.f32 %v907_v10  ;;  %vm554_vm1 = vweird.f32 %v517_v52  ;;  %vm727_vm8 = vcmask 256000  }
 0x130   : > { %v520_v51 = vmul.f32 %v905_v6, %v519_v7  ;;  %vm546_vm0 = vmor %vm544_vm14, %vm545_vm15 }
 0x131   : > { %v540_v60 = vmul.f32 %v907_v10, %v539_v63 }
 0x132   : > { %v521_v47 = vmul.f32 0.5, %v520_v51  ;;  %v503_v53 = vpop.xlane.xlu2 %502 }
 0x133   : > { %v511_v54 = vmul.f32 %v503_v53, %v485_v15  ;;  %v541_v62 = vmul.f32 0.5, %v540_v60 }
 0x134   : > { %v522_v48 = vsub.f32 1.5, %v521_v47 }
 0x135   : > { %v515_v55 = vadd.f32 1e-06, %v511_v54  ;;  %v542_v38 = vsub.f32 1.5, %v541_v62 }
 0x136   : > { %v523_v59 = vmul.f32 %v905_v6, %v522_v48 }
 0x137   : > { %908 = vrsqrt.f32 %v515_v55  ;;  %vm534_vm12 = vweird.f32 %v515_v55  ;;  %v543_v30 = vmul.f32 %v907_v10, %v542_v38 }
 0x138   : > { %v527_v56 = vsel %vm526_vm10, %v905_v6, %v523_v59  ;;  %910 = vrsqrt.f32 %v517_v52 }
 0x139   : > { %v558_v57 = vmul.f32 %v527_v56, %v490_v21  ;;  %v547_v21 = vsel %vm546_vm0, %v907_v10, %v543_v30 }
 0x13a   : > { %v560_v33 = vmul.f32 %v547_v21, %v1315_v46  ;;  %v656_v46 = vld [vmem:[%s1444_s5 + $0x48] sm:$0xff] }
 0x13b   : > { %818 = vmatmul.msk.f32.vlgmr.msra.gmra.mxu0 %vm466_vm6, %v558_v57  ;;  %679 = vmatpush.msra.mxu1 %v656_v46 }
 0x13c   : > { %838 = vmatpush.msra.mxu2 %v656_v46  ;;  %839 = vmatpush.msra.mxu3 %v656_v46 }
 0x13d   : > { %v909_v58 = vpop.eup %908 }
 0x13e   : > { %v529_v0 = vmul.f32 %v909_v58, %v515_v55  ;;  %v911_v25 = vpop.eup %910  ;;  %vm535_vm11 = vweird.f32 %v909_v58 }
 0x13f   : > { %v549_v12 = vmul.f32 %v911_v25, %v517_v52  ;;  %vm536_vm13 = vmor %vm534_vm12, %vm535_vm11  ;;  %vm555_vm2 = vweird.f32 %v911_v25 }
 0x140   : > { %v530_v61 = vmul.f32 %v909_v58, %v529_v0  ;;  %vm556_vm3 = vmor %vm554_vm1, %vm555_vm2 }
 0x141   : > { %v550_v15 = vmul.f32 %v911_v25, %v549_v12 }
 0x142   : > { %v531_v27 = vmul.f32 0.5, %v530_v61 }
 0x143   : > { %v551_v22 = vmul.f32 0.5, %v550_v15 }
 0x144   : > { %v532_v13 = vsub.f32 1.5, %v531_v27 }
 0x145   : > { %v552_v14 = vsub.f32 1.5, %v551_v22 }
 0x146   : > { %v533_v17 = vmul.f32 %v909_v58, %v532_v13 }
 0x147   : > { %v553_v34 = vmul.f32 %v911_v25, %v552_v14 }
 0x148   : > { %v537_v19 = vsel %vm536_vm13, %v909_v58, %v533_v17 }
 0x149   : > { %v559_v11 = vmul.f32 %v537_v19, %v491_v42  ;;  %v557_v35 = vsel %vm556_vm3, %v911_v25, %v553_v34  ;;  %v652_v42 = vld [vmem:[%s1444_s5 + $0x28] sm:$0xff] }
 0x14a   : > { %v561_v36 = vmul.f32 %v557_v35, %v1321_v39  ;;  %v655_v39 = vld [vmem:[%s1444_s5 + $0x40] sm:$0xff] }
 0x14b   : > { %819 = vmatmul.msk.f32.gmra.mxu0 %vm466_vm6, %v559_v11  ;;  %680 = vmatpush.msra.mxu1 %v655_v39 }
 0x14c   : > { %840 = vmatpush.msra.mxu2 %v655_v39  ;;  %841 = vmatpush.msra.mxu3 %v655_v39 }
 0x14d   : > { %681 = vmatpush.msra.mxu1 %v654_v24 }
 0x14e   : > { %842 = vmatpush.msra.mxu2 %v654_v24  ;;  %843 = vmatpush.msra.mxu3 %v654_v24 }
 0x14f   : > { %682 = vmatpush.msra.mxu1 %v653_v18 }
 0x150   : > { %844 = vmatpush.msra.mxu2 %v653_v18  ;;  %845 = vmatpush.msra.mxu3 %v653_v18 }
 0x151   : > { %683 = vmatpush.msra.mxu1 %v652_v42 }
 0x152   : > { %846 = vmatpush.msra.mxu2 %v652_v42  ;;  %847 = vmatpush.msra.mxu3 %v652_v42 }
 0x153   : > { %820 = vmatmul.msk.f32.gmra.mxu0 %vm466_vm6, %v560_v33  ;;  %684 = vmatpush.msra.mxu1 %v651_v2 }
 0x154   : > { %848 = vmatpush.msra.mxu2 %v651_v2  ;;  %849 = vmatpush.msra.mxu3 %v651_v2 }
 0x155   : > { %685 = vmatpush.msra.mxu1 %v650_v26 }
 0x156   : > { %850 = vmatpush.msra.mxu2 %v650_v26  ;;  %851 = vmatpush.msra.mxu3 %v650_v26 }
 0x157   : > { %686 = vmatpush.msra.mxu1 %v649_v23 }
 0x158   : > { %852 = vmatpush.msra.mxu2 %v649_v23  ;;  %853 = vmatpush.msra.mxu3 %v649_v23 }
 0x159   : > { %687 = vmatpush.msra.mxu1 %v648_v29 }
 0x15a   : > { %854 = vmatpush.msra.mxu2 %v648_v29  ;;  %855 = vmatpush.msra.mxu3 %v648_v29 }
 0x15b   : > { %821 = vmatmul.msk.f32.gmra.mxu0 %vm466_vm6, %v561_v36  ;;  %688 = vmatpush.msra.mxu1 %v647_v44 }
 0x15c   : > { %856 = vmatpush.msra.mxu2 %v647_v44  ;;  %857 = vmatpush.msra.mxu3 %v647_v44 }
 0x1b8   : > { %v599_v3 = vpop.f32.mrf.mxu0 }
 0x1b9   : > { %v600_v4 = vadd.f32 %v901_v45, %v599_v3 }
 0x1bb   : > { %v615_v49 = vmul.f32 0.044715, %v600_v4  ;;  %v611_v47 = vmul.f32 0.5, %v600_v4 }
 0x1bd   : > { %v619_v5 = vmul.f32 %v615_v49, %v600_v4 }
 0x1bf   : > { %v623_v31 = vmul.f32 %v619_v5, %v600_v4 }
 0x1c1   : > { %v627_v6 = vadd.f32 %v623_v31, %v600_v4 }
 0x1c3   : > { %v631_v40 = vmul.f32 0.7978846, %v627_v6 }
 0x1c5   : > { %912 = vtanh.f32 %v631_v40 }
 0x1c8   : > { %v602_v7 = vpop.f32.mrf.mxu0 }
 0x1c9   : > { %v603_v50 = vadd.f32 %v901_v45, %v602_v7 }
 0x1cb   : > { %v913_v51 = vpop.eup %912  ;;  %v616_v41 = vmul.f32 0.044715, %v603_v50  ;;  %v612_v27 = vmul.f32 0.5, %v603_v50 }
 0x1cc   : > { %v639_v53 = vadd.f32 1.0, %v913_v51 }
 0x1cd   : > { %v620_v54 = vmul.f32 %v616_v41, %v603_v50 }
 0x1ce   : > { %v643_v48 = vmul.f32 %v639_v53, %v611_v47 }
 0x1cf   : > { %v624_v52 = vmul.f32 %v620_v54, %v603_v50 }
 0x1d0   : > { %v605_v55 = vpop.f32.mrf.mxu0  ;;  %822 = vmatmul.msk.f32.vlgmr.msra.gmra.mxu1 %vm660_vm5, %v643_v48 }
 0x1d1   : > { %v606_v59 = vadd.f32 %v901_v45, %v605_v55  ;;  %v628_v10 = vadd.f32 %v624_v52, %v603_v50 }
 0x1d3   : > { %v617_v56 = vmul.f32 0.044715, %v606_v59  ;;  %v632_v57 = vmul.f32 0.7978846, %v628_v10  ;;  %v613_v30 = vmul.f32 0.5, %v606_v59 }
 0x1d5   : > { %914 = vtanh.f32 %v632_v57  ;;  %v621_v63 = vmul.f32 %v617_v56, %v606_v59 }
 0x1d7   : > { %v625_v58 = vmul.f32 %v621_v63, %v606_v59 }
 0x1d8   : > { %v608_v60 = vpop.f32.mrf.mxu0 }
 0x1d9   : > { %v609_v0 = vadd.f32 %v901_v45, %v608_v60  ;;  %v629_v25 = vadd.f32 %v625_v58, %v606_v59 }
 0x1db   : > { %v915_v61 = vpop.eup %914  ;;  %v618_v62 = vmul.f32 0.044715, %v609_v0  ;;  %v633_v12 = vmul.f32 0.7978846, %v629_v25  ;;  %v614_v34 = vmul.f32 0.5, %v609_v0 }
 0x1dc   : > { %v640_v13 = vadd.f32 1.0, %v915_v61 }
 0x1dd   : > { %916 = vtanh.f32 %v633_v12  ;;  %v622_v38 = vmul.f32 %v618_v62, %v609_v0 }
 0x1de   : > { %v644_v15 = vmul.f32 %v640_v13, %v612_v27 }
 0x1df   : > { %v626_v17 = vmul.f32 %v622_v38, %v609_v0 }
 0x1e0   : > { %823 = vmatmul.msk.f32.vlgmr.msra.gmra.mxu2 %vm660_vm5, %v644_v15 }
 0x1e1   : > { %v630_v19 = vadd.f32 %v626_v17, %v609_v0 }
 0x1e3   : > { %v917_v11 = vpop.eup %916  ;;  %v634_v22 = vmul.f32 0.7978846, %v630_v19 }
 0x1e4   : > { %v641_v14 = vadd.f32 1.0, %v917_v11 }
 0x1e5   : > { %918 = vtanh.f32 %v634_v22 }
 0x1e6   : > { %v645_v21 = vmul.f32 %v641_v14, %v613_v30 }
 0x1e8   : > { %824 = vmatmul.msk.f32.vlgmr.msra.gmra.mxu3 %vm660_vm5, %v645_v21 }
 0x1eb   : > { %v919_v33 = vpop.eup %918 }
 0x1ec   : > { %v642_v35 = vadd.f32 1.0, %v919_v33 }
 0x1ee   : > { %v646_v36 = vmul.f32 %v642_v35, %v614_v34 }
 0x1f0   : > { %825 = vmatmul.msk.f32.gmra.mxu3 %vm660_vm5, %v646_v36 }
 0x24d   : > { %v690_v16 = vpop.f32.mrf.mxu1 }
 0x24e   : > { %v691_v46 = vadd.f32 %v690_v16, %v659_v43 }
 0x250   : > { %v706_v39 = vrot.slane %v691_v46, 5 }
 0x252   : > { %v718_v24 = vadd.f32 %v706_v39, %v1147_v32 }
 0x254   : > { %725 = vst.msk [vmem:[%s247_s9 - $0x3] sm:$0xf8] %vm724_vm7, %v718_v24 }
 0x263   : > { %v693_v18 = vpop.f32.mrf.mxu2 }
 0x264   : > { %v694_v42 = vadd.f32 %v693_v18, %v659_v43 }
 0x266   : > { %v707_v2 = vrot.slane %v694_v42, 5 }
 0x268   : > { %v708_v26 = vsel %vm410_vm4, %v706_v39, %v707_v2  ;;  %v720_v1 = vadd.f32 %v707_v2, %v1261_v28 }
 0x269   : > { %v719_v23 = vadd.f32 %v708_v26, %v1158_v37 }
 0x26a   : > { %728 = vst.msk [vmem:[%s247_s9 + $0xd] sm:$0x7] %vm727_vm8, %v720_v1 }
 0x26b   : > { %726 = vst.msk [vmem:[%s247_s9 + $0x5] sm:$0xff] %vm466_vm6, %v719_v23  ;;  %v696_v29 = vpop.f32.mrf.mxu3 }
 0x26c   : > { %v697_v44 = vadd.f32 %v696_v29, %v659_v43 }
 0x26e   : > { %v709_v32 = vrot.slane %v697_v44, 5 }
 0x270   : > { %v721_v45 = vadd.f32 %v709_v32, %v1097_v8 }
 0x272   : > { %729 = vst.msk [vmem:[%s247_s9 + $0xd] sm:$0xf8] %vm724_vm7, %v721_v45 }
 0x273   : > { %v699_v28 = vpop.f32.mrf.mxu3 }
 0x274   : > { %v700_v3 = vadd.f32 %v699_v28, %v659_v43 }
 0x276   : > { %v710_v37 = vrot.slane %v700_v3, 5 }
 0x278   : > { %v711_v4 = vsel %vm410_vm4, %v709_v32, %v710_v37  ;;  %v723_v49 = vadd.f32 %v710_v37, %v1213_v20 }
 0x279   : > { %v722_v8 = vadd.f32 %v711_v4, %v1100_v9 }
 0x27a   : > { %731 = vst.msk [vmem:[%s247_s9 + $0x1d] sm:$0x7] %vm727_vm8, %v723_v49 }
 0x27b   : > { %730 = vst.msk [vmem:[%s247_s9 + $0x15] sm:$0xff] %vm466_vm6, %v722_v8 }
 0x27c   : > { %947 = shalt.err (!%p944_p3)
}
 0x27d   : > { %s985_s28 = smov 128   ;;  %s986_s9 = smov 8  }
 0x27e   : > { %859 = dma.vmem_to_hbm [thread:$0]  (%p1060_p5), %s747_s14, 512, %s749_s15, %s733_s25, %s985_s28, %s985_s28, %s986_s9  }
 0x27f PF: > { %p865_p4 = scmp.ge.s32.totalorder %s982_s24, 2  ;;  %s763_s10 = sand.u32 1, %s970_s21  }
 0x280   : > { %s764_s11 = scalar_lea.sflag [#allocation3], %s763_s10 }
 0x281   : > { %p862_p7 = pnand %p865_p4, %p1064_p6 }
 0x283   : > { %p863_p8 = pneg %p862_p7 }
 0x285   : > { %965 = dma.done.wait (%p863_p8), %s764_s11, 512  }
 0x286   : > { %967 = vsyncadd (%p863_p8), %s764_s11, 4294966784  ;;  %p16_p9 = scmp.ge.s32.totalorder %s1047_s27, 4   ;;  %s1448_s21 = smov %s974_s22 }
 0x287   : > { %s1449_s22 = smov %s978_s23  ;;  %s1450_s23 = smov %s1058_s30 }
 0x288   : > { %s1451_s24 = smov %s1047_s27  ;;  %18 = sbr.rel (!%p16_p9) target bundleno = 3 (0x3), region = 79 }
 0x28d   :  { %770 = vsyncpa [#allocation3], 1 }
 0x28e   :  { %772 = vsyncpa [#allocation3 + $0x1], 1 }

</bundles_post_ra>
